<compile_context>
chip_gen: v5e
topology: v5e:2x2
jax: 0.10.0
libtpu: 0.0.40
codegen_flags: <defaults>
</compile_context>

<pallas_src>
import jax
import jax.numpy as jnp
from jax.experimental import pallas as pl
from jax.experimental.pallas import tpu as pltpu

HIDDEN = 20                  # network_unit in the PyTorch module
N_BRANCH = 3                 # A, T, N branches
H3 = HIDDEN * N_BRANCH       # 60 real hidden units
PADH = 64                    # hidden width padded to a clean sublane multiple
PADO = 8                     # output rows padded 3 -> 8 (one clean sublane tile)

# --- parameter-slab layout (rows, cols), float32 master copy -----------------
#   [0:64,    0:64 ]  W2   (out, in)   layer-2 block-diagonal weights
#   [0:64,  128:192]  W3   (out, in)   layer-3 block-diagonal weights
#   [64:72,   0:64 ]  W4   (out, in)   layer-4 weights (3 real rows, 5 zero)
#   [0:64,   64    ]  w1   (64,)       layer-1 weights (input dim is 1)
#   [0:64,   65    ]  b1   [0:64, 66] b2   [0:64, 67] b3
#   [64:72,  64    ]  b4   (3 real rows, 5 zero)
SLAB_ROWS = PADH + PADO      # 72
SLAB_COLS = 256              # two clean 128-lane tiles
W3_COL = 128
VEC_COL = 64


# -----------------------------------------------------------------------------
# Pallas kernel: fused 4-layer MLP, transposed ("time on lanes") formulation.
#   x_ref : (1, tile_n)      p_ref : (72, 256)      o_ref : (8, tile_n) f32
# -----------------------------------------------------------------------------
def _mlp3_kernel(x_ref, p_ref, o_ref):
    cdt = x_ref.dtype                                   # f32, or bf16 on v6e/v7x

    x = x_ref[...]                                      # (1, TN)
    w2 = p_ref[0:PADH, 0:PADH]                          # (64, 64)
    w3 = p_ref[0:PADH, W3_COL:W3_COL + PADH]            # (64, 64)
    w4 = p_ref[PADH:PADH + PADO, 0:PADH]                # (8, 64)
    w1 = p_ref[0:PADH, VEC_COL + 0:VEC_COL + 1]         # (64, 1)
    b1 = p_ref[0:PADH, VEC_COL + 1:VEC_COL + 2]
    b2 = p_ref[0:PADH, VEC_COL + 2:VEC_COL + 3]
    b3 = p_ref[0:PADH, VEC_COL + 3:VEC_COL + 4]
    b4 = p_ref[PADH:PADH + PADO, VEC_COL:VEC_COL + 1]   # (8, 1)

    # Layer 1 has a depth-1 contraction: VPU broadcast multiply-add, not MXU.
    h = jnp.tanh(w1 * x + b1)                           # (64, TN), dtype cdt

    # Layers 2 & 3: real (64,64) matmuls, f32 accumulate, tanh in cdt (bf16
    # EUP on v6e/v7x, f32 on v5e).
    h = jnp.tanh(jnp.dot(w2, h, preferred_element_type=jnp.float32)
                 .astype(cdt) + b2)
    h = jnp.tanh(jnp.dot(w3, h, preferred_element_type=jnp.float32)
                 .astype(cdt) + b3)

    # Layer 4: (8,64) @ (64,TN) -> (8,TN), lane-dense f32 output.
    y = (jnp.dot(w4, h, preferred_element_type=jnp.float32)
         + b4.astype(jnp.float32))
    o_ref[...] = y.astype(o_ref.dtype)


def _default_compute_dtype():
    """bf16 activations only where the VPU/EUP support them (v6e / v7x)."""
    try:
        kind = jax.devices()[0].device_kind.lower()
    except Exception:
        return jnp.float32
    if any(tag in kind for tag in ("v6", "v7", "7x")):
        return jnp.bfloat16
    return jnp.float32


def simple_network_ad_forward(x, param_slab, *, tile_n=1024, compute_dtype=None):
    """x: (N, 1) or (N,) float32 time samples.  Returns (N, 3) float32,
    identical to torch.cat((A_out, T_out, N_out), 1)."""
    x = jnp.asarray(x, jnp.float32).reshape(-1)
    N = int(x.shape[0])

    cdt = _default_compute_dtype() if compute_dtype is None else compute_dtype

    # Lane-dense tiling: time samples sit on the 128-wide lane axis.
    # Keep >= 2 grid steps whenever possible so the "parallel" axis can be
    # sharded across v7x's 2 TensorCores; Pallas masks the ragged last block.
    tile_n = max(128, (int(tile_n) // 128) * 128)
    lane_blocks = pl.cdiv(N, 128)
    if lane_blocks >= 2:
        tile_n = min(tile_n, 128 * pl.cdiv(lane_blocks, 2))
    else:
        tile_n = 128
    grid = (pl.cdiv(N, tile_n),)

    xt = x[None, :].astype(cdt)              # (1, N) -- no wrapper padding pass
    slab = param_slab.astype(cdt)            # (72, 256)

    # Advisory cost hint (EUP tanh dominates; memory is negligible).
    itm = jnp.dtype(cdt).itemsize
    flops = 2 * N * (PADH + 2 * PADH * PADH + PADO * PADH)
    transcendentals = 3 * PADH * N
    bytes_accessed = N * (itm + PADO * 4) + SLAB_ROWS * SLAB_COLS * itm

    out_t = pl.pallas_call(
        _mlp3_kernel,
        out_shape=jax.ShapeDtypeStruct((PADO, N), jnp.float32),
        grid_spec=pltpu.PrefetchScalarGridSpec(
            num_scalar_prefetch=0,
            grid=grid,
            in_specs=[
                pl.BlockSpec((1, tile_n), lambda i: (0, i)),          # x tile
                pl.BlockSpec((SLAB_ROWS, SLAB_COLS), lambda i: (0, 0)),  # params (resident)
            ],
            out_specs=pl.BlockSpec((PADO, tile_n), lambda i: (0, i)),
        ),
        compiler_params=pltpu.CompilerParams(
            dimension_semantics=("parallel",)),
        cost_estimate=pl.CostEstimate(
            flops=int(flops),
            transcendentals=int(transcendentals),
            bytes_accessed=int(bytes_accessed)),
    )(xt, slab)

    # One small slice+transpose outside the kernel recovers the module's
    # (N, 3) layout.  (A downstream consumer could take (3, N) directly.)
    return out_t[:N_BRANCH, :].T


# -----------------------------------------------------------------------------
# Deterministic parameter construction (PyTorch-Linear-style uniform init)
# -----------------------------------------------------------------------------
def _linear_init(key, fan_in, fan_out):
    kw, kb = jax.random.split(key)
    bound = 1.0 / jnp.sqrt(jnp.asarray(float(fan_in)))
    w = jax.random.uniform(kw, (fan_in, fan_out), jnp.float32, -bound, bound)
    b = jax.random.uniform(kb, (fan_out,), jnp.float32, -bound, bound)
    return w, b


def make_params(key):
    """Per-branch weights, packed block-diagonally, padded (60->64 hidden,
    3->8 outputs) and laid out in the single (72, 256) parameter slab used by
    the kernel.  Also returns the raw per-branch weights for the reference."""
    keys = jax.random.split(key, N_BRANCH * 4).reshape(N_BRANCH, 4, 2)
    branch = []
    for b in range(N_BRANCH):
        l1 = _linear_init(keys[b, 0], 1, HIDDEN)
        l2 = _linear_init(keys[b, 1], HIDDEN, HIDDEN)
        l3 = _linear_init(keys[b, 2], HIDDEN, HIDDEN)
        l4 = _linear_init(keys[b, 3], HIDDEN, 1)
        branch.append((l1, l2, l3, l4))

    def block_diag(ms):
        out = jnp.zeros((H3, H3), jnp.float32)
        for i, m in enumerate(ms):
            out = out.at[i * HIDDEN:(i + 1) * HIDDEN,
                         i * HIDDEN:(i + 1) * HIDDEN].set(m)
        return out

    # (in, out) packing, exactly mirroring the three independent branches.
    w1 = jnp.concatenate([br[0][0] for br in branch], axis=1)        # (1, 60)
    b1 = jnp.concatenate([br[0][1] for br in branch])                # (60,)
    w2 = block_diag([br[1][0] for br in branch])                     # (60, 60)
    b2 = jnp.concatenate([br[1][1] for br in branch])
    w3 = block_diag([br[2][0] for br in branch])
    b3 = jnp.concatenate([br[2][1] for br in branch])
    w4 = jnp.zeros((H3, N_BRANCH), jnp.float32)
    for i, br in enumerate(branch):
        w4 = w4.at[i * HIDDEN:(i + 1) * HIDDEN, i].set(br[3][0][:, 0])
    b4 = jnp.concatenate([br[3][1] for br in branch])                # (3,)

    # Single padded slab; all padding entries are zero so padded hidden units
    # stay exactly 0 through tanh and contribute nothing downstream.
    slab = jnp.zeros((SLAB_ROWS, SLAB_COLS), jnp.float32)
    slab = slab.at[0:H3, 0:H3].set(w2.T)                              # W2 (out,in)
    slab = slab.at[0:H3, W3_COL:W3_COL + H3].set(w3.T)                # W3 (out,in)
    slab = slab.at[PADH:PADH + N_BRANCH, 0:H3].set(w4.T)              # W4 (out,in)
    slab = slab.at[0:H3, VEC_COL + 0].set(w1[0, :])
    slab = slab.at[0:H3, VEC_COL + 1].set(b1)
    slab = slab.at[0:H3, VEC_COL + 2].set(b2)
    slab = slab.at[0:H3, VEC_COL + 3].set(b3)
    slab = slab.at[PADH:PADH + N_BRANCH, VEC_COL].set(b4)
    return slab, branch


def reference_forward(x, branch):
    """Pure-JAX reference: three independent MLPs then concat (== torch)."""
    x = jnp.asarray(x, jnp.float32).reshape(-1, 1)
    outs = []
    for (l1, l2, l3, l4) in branch:
        h = jnp.tanh(x @ l1[0] + l1[1])
        h = jnp.tanh(h @ l2[0] + l2[1])
        h = jnp.tanh(h @ l3[0] + l3[1])
        outs.append(h @ l4[0] + l4[1])
    return jnp.concatenate(outs, axis=1)


# TODO(synk): the module's loss() / GroundTruthAD rely on scipy .mat files and
# autograd PINN residuals; only the forward pass is implemented here.

if __name__ == "__main__":
    key = jax.random.PRNGKey(0)
    kp, _ = jax.random.split(key)

    param_slab, branch_params = make_params(kp)

    # Input consistent with the module: x = encode_t(i * T_unit), a (T_N, 1)
    # column of scaled time points.  T_N deliberately NOT a multiple of 128 to
    # exercise the ragged-last-block path.
    T_N = 500
    t = jnp.arange(T_N, dtype=jnp.float32)[:, None] * 0.01   # (T_N, 1)
    x = t / t.max() * 2.0                                    # encode_t-like scaling

    ref = reference_forward(x, branch_params)

    # 1) float32 path (valid on all generations): tight check vs reference.
    out_f32 = jax.block_until_ready(
        simple_network_ad_forward(x, param_slab, tile_n=1024,
                                  compute_dtype=jnp.float32))
    assert out_f32.shape == (T_N, N_BRANCH)
    assert jnp.allclose(out_f32, ref, atol=1e-4, rtol=1e-4), \
        "f32 kernel mismatch vs reference"

    # 2) Auto path (bf16 activations on v6e/v7x, f32 elsewhere): sanity check.
    out_auto = jax.block_until_ready(
        simple_network_ad_forward(x, param_slab, tile_n=1024))
    assert out_auto.shape == (T_N, N_BRANCH)
    assert float(jnp.max(jnp.abs(out_auto - ref))) < 1e-1, \
        "auto-dtype kernel mismatch vs reference"

    print("KERNEL_OK")
</pallas_src>

<mosaic_0001>
module attributes {stable_mosaic.version = 11 : i64} {
  func.func @_mlp3_kernel(%arg0: i32, %arg1: memref<1x256xf32, #tpu.memory_space<vmem>>, %arg2: memref<72x256xf32, #tpu.memory_space<vmem>>, %arg3: memref<8x256xf32, #tpu.memory_space<vmem>>) attributes {dimension_semantics = [#tpu.dimension_semantics<parallel>], iteration_bounds = array<i64: 2>, scalar_prefetch = 0 : i64, scratch_operands = 0 : i64, tpu.core_type = #tpu.core_type<tc>, window_params = [{transform_indices = @transform_0, window_bounds = array<i64: 1, 256>}, {pipeline_mode = #tpu.pipeline_mode<synchronous>, transform_indices = @transform_1, window_bounds = array<i64: 72, 256>}, {transform_indices = @transform_2, window_bounds = array<i64: 8, 256>}]} {
    %c0 = arith.constant 0 : index
    %c0_0 = arith.constant 0 : index
    %0 = vector.load %arg1[%c0, %c0_0] : memref<1x256xf32, #tpu.memory_space<vmem>>, vector<1x256xf32>
    %c0_1 = arith.constant 0 : index
    %c0_2 = arith.constant 0 : index
    %1 = vector.load %arg2[%c0_1, %c0_2] : memref<72x256xf32, #tpu.memory_space<vmem>>, vector<64x64xf32>
    %c0_3 = arith.constant 0 : index
    %c128 = arith.constant 128 : index
    %2 = vector.load %arg2[%c0_3, %c128] : memref<72x256xf32, #tpu.memory_space<vmem>>, vector<64x64xf32>
    %c64 = arith.constant 64 : index
    %c0_4 = arith.constant 0 : index
    %3 = vector.load %arg2[%c64, %c0_4] : memref<72x256xf32, #tpu.memory_space<vmem>>, vector<8x64xf32>
    %c0_5 = arith.constant 0 : index
    %c64_6 = arith.constant 64 : index
    %4 = vector.load %arg2[%c0_5, %c64_6] : memref<72x256xf32, #tpu.memory_space<vmem>>, vector<64x1xf32>
    %c0_7 = arith.constant 0 : index
    %c65 = arith.constant 65 : index
    %5 = vector.load %arg2[%c0_7, %c65] : memref<72x256xf32, #tpu.memory_space<vmem>>, vector<64x1xf32>
    %c0_8 = arith.constant 0 : index
    %c66 = arith.constant 66 : index
    %6 = vector.load %arg2[%c0_8, %c66] : memref<72x256xf32, #tpu.memory_space<vmem>>, vector<64x1xf32>
    %c0_9 = arith.constant 0 : index
    %c67 = arith.constant 67 : index
    %7 = vector.load %arg2[%c0_9, %c67] : memref<72x256xf32, #tpu.memory_space<vmem>>, vector<64x1xf32>
    %c64_10 = arith.constant 64 : index
    %c64_11 = arith.constant 64 : index
    %8 = vector.load %arg2[%c64_10, %c64_11] : memref<72x256xf32, #tpu.memory_space<vmem>>, vector<8x1xf32>
    %9 = vector.broadcast %4 : vector<64x1xf32> to vector<64x256xf32>
    %10 = vector.broadcast %0 : vector<1x256xf32> to vector<64x256xf32>
    %11 = arith.mulf %9, %10 : vector<64x256xf32>
    %12 = vector.broadcast %5 : vector<64x1xf32> to vector<64x256xf32>
    %13 = arith.addf %11, %12 : vector<64x256xf32>
    %14 = math.tanh %13 : vector<64x256xf32>
    %cst = arith.constant dense<0.000000e+00> : vector<64x256xf32>
    %15 = tpu.matmul %1, %14, %cst {dimension_numbers = #tpu.dot_dimension_numbers<[1], [0], [0], [1], [0, 0, 1, 1], [], []>} : vector<64x64xf32>, vector<64x256xf32>, vector<64x256xf32> -> vector<64x256xf32>
    %16 = vector.broadcast %6 : vector<64x1xf32> to vector<64x256xf32>
    %17 = arith.addf %15, %16 : vector<64x256xf32>
    %18 = math.tanh %17 : vector<64x256xf32>
    %cst_12 = arith.constant dense<0.000000e+00> : vector<64x256xf32>
    %19 = tpu.matmul %2, %18, %cst_12 {dimension_numbers = #tpu.dot_dimension_numbers<[1], [0], [0], [1], [0, 0, 1, 1], [], []>} : vector<64x64xf32>, vector<64x256xf32>, vector<64x256xf32> -> vector<64x256xf32>
    %20 = vector.broadcast %7 : vector<64x1xf32> to vector<64x256xf32>
    %21 = arith.addf %19, %20 : vector<64x256xf32>
    %22 = math.tanh %21 : vector<64x256xf32>
    %cst_13 = arith.constant dense<0.000000e+00> : vector<8x256xf32>
    %23 = tpu.matmul %3, %22, %cst_13 {dimension_numbers = #tpu.dot_dimension_numbers<[1], [0], [0], [1], [0, 0, 1, 1], [], []>} : vector<8x64xf32>, vector<64x256xf32>, vector<8x256xf32> -> vector<8x256xf32>
    %24 = vector.broadcast %8 : vector<8x1xf32> to vector<8x256xf32>
    %25 = arith.addf %23, %24 : vector<8x256xf32>
    %c0_14 = arith.constant 0 : index
    %c0_15 = arith.constant 0 : index
    %26 = vector.load %arg3[%c0_14, %c0_15] : memref<8x256xf32, #tpu.memory_space<vmem>>, vector<8x256xf32>
    tpu.vector_store %arg3[%c0_14, %c0_15], %25 {strides = array<i32>} : memref<8x256xf32, #tpu.memory_space<vmem>>, vector<8x256xf32>,
    return
  }
  func.func @transform_0(%arg0: i32) -> (i32, i32) {
    %c0_i32 = arith.constant 0 : i32
    %c0_i32_0 = arith.constant 0 : i32
    return %c0_i32, %arg0 : i32, i32
  }
  func.func @transform_1(%arg0: i32) -> (i32, i32) {
    %c0_i32 = arith.constant 0 : i32
    %c0_i32_0 = arith.constant 0 : i32
    %c0_i32_1 = arith.constant 0 : i32
    return %c0_i32, %c0_i32_0 : i32, i32
  }
  func.func @transform_2(%arg0: i32) -> (i32, i32) {
    %c0_i32 = arith.constant 0 : i32
    %c0_i32_0 = arith.constant 0 : i32
    return %c0_i32, %arg0 : i32, i32
  }
}

</mosaic_0001>

<bundles_post_ra>
// kernel: tpu_custom_call.1
= control target key start
LH: loop header
LB: loop body
LE: loop exit
PB: predicated region body
PF: predicated region fallthrough
CT: control target
= control target key end

     0   :  { %7 = vsyncpa [#allocation3], 0  ;;  %s1426_s0 = inlined_call_operand.hbm [shape: f32[1,500], index: 0, kind: input, shape index: {}]   ;;  %s1427_s1 = inlined_call_operand.hbm [shape: f32[72,256], index: 1, kind: input, shape index: {}]   ;;  %s1428_s2 = inlined_call_operand.hbm [shape: f32[8,500], index: 2, kind: output, shape index: {}]  }
   0x1   :  { %9 = vsyncpa [#allocation3 + $0x1], 0 }
   0x2   :  { %10 = vsyncpa [#allocation6], 0 }
   0x3   :  { %11 = vsyncpa [#allocation4], 0 }
   0x4   :  { %13 = vsyncpa [#allocation4 + $0x1], 0  ;;  %s1151_s9 = smov 0   ;;  %s1153_s10 = smov 0  }
   0x5   :  { %s1155_s11 = smov 0   ;;  %s1157_s12 = smov 0  }
   0x6 LB: > { %s108_s15 = sshll.u32 %s1427_s1, 4  ;;  %s1175_s16 = sadd.s32 4294967295, %s1127_s12   ;;  %s1127_s12 = sphi %s1157_s12, %s1438_s12   ;;  %s1123_s11 = sphi %s1155_s11, %s1437_s11   ;;  %s1119_s10 = sphi %s1153_s10, %s1436_s10   ;;  %s1115_s9 = sphi %s1151_s9, %s1435_s9   ;;  %s109_s15 = int_to_ptr.hbm [resolvable:$true] %s108_s15 }
   0x7   : > { %p771_p0 = scmp.ge.s32.totalorder %s1127_s12, 1  ;;  %p40_p1 = scmp.eq.s32.totalorder %s1175_s16, 0 }
   0x8   : > { %p97_p2 = scmp.lt.s32.totalorder %s1127_s12, 3  ;;  %s1129_s18 = smov [#allocation5]  }
   0x9   : > { %s110_s19 = sshll.u32 %s1129_s18, 4  ;;  %s1130_s20 = smov 256   ;;  %s111_s19 = int_to_ptr.vmem [resolvable:$true] %s110_s19 }
   0xa   : > { %p1180_p3 = pnand %p771_p0, %p97_p2  ;;  %s1131_s21 = smov 16  }
   0xb   : > { %s770_s22 = sadd.s32 4294967294, %s1127_s12   ;;  %s1191_s23 = sadd.s32 1, %s1127_s12  }
   0xc   : > { %p828_p4 = pneg %p1180_p3  ;;  %s26_s24 = sadd.s32 1, %s1123_s11 }
   0xd   : > { %s23_s25 = ssub.s32 %s1127_s12, %s1191_s23  ;;  %p33_p7 = scmp.ne.s32.totalorder %s1123_s11, %s1119_s10 }
   0xe   : > { %p829_p6 = pnand %p828_p4, %p40_p1  ;;  %p24_p8 = scmp.eq.s32.totalorder %s23_s25, 0 }
   0xf   : > { %p34_p9 = scmp.eq.s32.totalorder %s1127_s12, 0  ;;  %p39_p10 = scmp.ne.s32.totalorder %s1119_s10, %s1115_s9 }
  0x10   : > { %831 = dma.hbm_to_vmem [thread:$0]  (!%p829_p6), %s109_s15, 2304, %s111_s19, [#allocation6], %s1130_s20, %s1130_s20, %s1131_s21  }
  0x11   : > { %p84_p11 = scmp.eq.s32.totalorder %s1175_s16, 1  ;;  %p1207_p12 = por %p40_p1, %p39_p10 }
  0x12   : > { %s1203_s26 = scalar_select %p24_p8, %s1123_s11, %s26_s24  }
  0x13   : > { %p1211_p13 = por %p84_p11, %p33_p7  ;;  %p90_p0 = scmp.eq.s32.totalorder %s770_s22, 1 }
  0x14   : > { %p35_p2 = por %p34_p9, %p33_p7  ;;  %s124_s29 = sand.u32 1, %s1123_s11  }
  0x15   : > { %p1216_p4 = por %p90_p0, %p39_p10  ;;  %p841_p6 = scmp.lt.s32.totalorder %s1127_s12, 2 }
  0x16   : > { %s774_s3 = sshll.u32 %s124_s29, 1  ;;  %s775_s4 = sshll.u32 %s1127_s12, 1 }
  0x17   : > { %s132_s7 = scalar_lea.hbm %s1426_s0, %s775_s4  ;;  %s128_s13 = scalar_lea.vmem [#allocation2], %s774_s3 }
  0x18   : > { %s134_s8 = sshll.u32 %s132_s7, 4  ;;  %s136_s14 = sshll.u32 %s128_s13, 4  ;;  %s135_s8 = int_to_ptr.hbm [resolvable:$true] %s134_s8  ;;  %s137_s14 = int_to_ptr.vmem [resolvable:$true] %s136_s14 }
  0x19   : > { %p1225_p8 = pnand %p841_p6, %p35_p2  ;;  %s125_s18 = scalar_lea.sflag [#allocation3], %s124_s29 }
  0x1a   : > { %s1027_s19 = sshra.s32 %s135_s8, 4  ;;  %s1034_s24 = scalar_lea.hbm %s1426_s0, 4  ;;  %s1028_s19 = int_to_ptr.hbm [resolvable:$true] %s1027_s19 }
  0x1b   : > { %s1029_s20 = scalar_lea.hbm %s1028_s19, 2  ;;  %p1031_p9 = pneg %p1225_p8 }
  0x1c   : > { %p1030_p7 = scmp.ne.s32.totalorder %s1028_s19, %s1029_s20  ;;  %p1035_p0 = scmp.lt.s32.totalorder %s1028_s19, %s1426_s0 }
  0x1d   : > { %p1036_p2 = scmp.lt.s32.totalorder %s1034_s24, %s1029_s20 }
  0x1e   : > { %p1032_p10 = pnand %p1031_p9, %p1030_p7 }
  0x1f   : > { %p1037_p6 = por %p1036_p2, %p1035_p0 }
  0x20   : > { %p1033_p11 = pneg %p1032_p10 }
  0x22   : > { %p1038_p5 = pnand %p1037_p6, %p1033_p11 }
  0x24   : > { %1041 = shalt.err (!%p1038_p5)
}
  0x25   : > { %835 = dma.hbm_to_vmem [thread:$0]  (!%p1225_p8), %s135_s8, 32, %s137_s14, %s125_s18  }
  0x26   : > { %145 = sbr.rel (%p1180_p3) target bundleno = 767 (0x2ff), region = 28  ;;  %s1242_s29 = sand.u32 (!%p1180_p3), 1, %s1119_s10  }
  0x27   : > { %s777_s4 = sshll.u32 (!%p1180_p3), %s1242_s29, 1  ;;  %s148_s5 = scalar_lea.sflag (!%p1180_p3), [#allocation3], %s1242_s29 }
  0x28   : > { %s1246_s6 = scalar_lea.vmem (!%p1180_p3), [#allocation2], %s777_s4 }
  0x2b   : > { %1102 = dma.done.wait (%p1207_p12), %s148_s5, 32  }
  0x2c   : > { %1104 = vsyncadd (%p1207_p12), %s148_s5, 4294967264 }
  0x2d   : > { %1106 = dma.done.wait (%p40_p1), [#allocation6], 2304  }
  0x2e   : > { %1108 = vsyncadd (%p40_p1), [#allocation6], 4294964992  ;;  %v1132_v0 = vmov 65   ;;  %v1133_v1 = vmov 64   ;;  %v1257_v2 = vld [vmem:[#allocation5 + $0x70] sm:$0xff]  ;;  %v1261_v3 = vld [vmem:[#allocation5 + $0x60] sm:$0xff] }
  0x2f   : > { %884 = vset.pattern.permute.xlu1 %v1132_v0  ;;  %883 = vset.pattern.permute.xlu0 %v1133_v1  ;;  %v1264_v4 = vld [vmem:[#allocation5 + $0x50] sm:$0xff]  ;;  %v1266_v5 = vld [vmem:[#allocation5 + $0x40] sm:$0xff]  ;;  %v180_v11 = vld [vmem:[%s1246_s6] sm:$0x3]  ;;  %v1134_v48 = vmov 66   ;;  %vm355_vm0 = vcmask 523264  }
  0x30   : > { %886 = vset.pattern.permute.xlu2 %v1132_v0  ;;  %288 = vperm.xlu1 %884, %v1257_v2   ;;  %v1273_v6 = vld [vmem:[#allocation5 + $0x30] sm:$0xff]  ;;  %v1278_v7 = vld [vmem:[#allocation5 + $0x20] sm:$0xff]  ;;  %v1294_v13 = vperm.slane %v180_v11, 0  ;;  %v1296_v14 = vperm.slane %v180_v11, 1  ;;  %s779_s17 = sshll.u32 %s1242_s29, 4  ;;  %s819_s27 = sshll.u32 %s1175_s16, 4 }
  0x31   : > { %235 = vperm.xlu0 %883, %v1257_v2   ;;  %284 = vperm.xlu2 %886, %v1261_v3   ;;  %v1280_v8 = vld [vmem:[#allocation5 + $0x10] sm:$0xff]  ;;  %v1286_v9 = vld [vmem:[#allocation5] sm:$0xff]  ;;  %s685_s13 = scalar_lea.hbm %s1428_s2, %s819_s27  ;;  %s177_s14 = scalar_lea.vmem [#allocation7], %s779_s17 }
  0x32   : > { %s687_s15 = sshll.u32 %s177_s14, 4  ;;  %s689_s18 = sshll.u32 %s685_s13, 4  ;;  %s688_s15 = int_to_ptr.vmem [resolvable:$true] %s687_s15  ;;  %s690_s18 = int_to_ptr.hbm [resolvable:$true] %s689_s18 }
  0x33   : > { %s674_s19 = scalar_lea.sflag [#allocation4], %s1242_s29  ;;  %s1071_s20 = sshra.s32 %s690_s18, 4  ;;  %s1072_s20 = int_to_ptr.hbm [resolvable:$true] %s1071_s20 }
  0x34   : > { %s1073_s16 = scalar_lea.hbm %s1072_s20, 16  ;;  %s1077_s24 = scalar_lea.hbm %s1428_s2, 32 }
  0x35   : > { %p1074_p1 = scmp.ne.s32.totalorder %s1072_s20, %s1073_s16  ;;  %p1078_p12 = scmp.lt.s32.totalorder %s1072_s20, %s1428_s2 }
  0x36   : > { %p1079_p8 = scmp.lt.s32.totalorder %s1077_s24, %s1073_s16 }
  0x37   : > { %p1075_p3 = pnand %p1074_p1, %p1211_p13 }
  0x38   : > { %885 = vset.pattern.permute.xlu1 %v1133_v1  ;;  %p1080_p7 = por %p1079_p8, %p1078_p12 }
  0x39   : > { %230 = vperm.xlu0 %883, %v1261_v3   ;;  %225 = vperm.xlu1 %885, %v1264_v4   ;;  %p1076_p5 = pneg %p1075_p3 }
  0x3a   : > { %887 = vset.pattern.permute.xlu2 %v1133_v1 }
  0x3b   : > { %220 = vperm.xlu2 %887, %v1266_v5   ;;  %p1081_p9 = pnand %p1080_p7, %p1076_p5 }
  0x41   : > { %888 = vset.pattern.permute.xlu0 %v1132_v0  ;;  %215 = vperm.xlu1 %885, %v1273_v6  }
  0x42   : > { %280 = vperm.xlu0 %888, %v1264_v4  }
  0x43   : > { %889 = vset.pattern.permute.xlu2 %v1132_v0 }
  0x44   : > { %276 = vperm.xlu2 %889, %v1266_v5  }
  0x49   : > { %210 = vperm.xlu1 %885, %v1278_v7  }
  0x4a   : > { %890 = vset.pattern.permute.xlu0 %v1133_v1 }
  0x4b   : > { %205 = vperm.xlu0 %890, %v1280_v8  }
  0x4c   : > { %272 = vperm.xlu2 %889, %v1273_v6  }
  0x51   : > { %891 = vset.pattern.permute.xlu1 %v1132_v0 }
  0x52   : > { %268 = vperm.xlu1 %891, %v1278_v7  }
  0x53   : > { %894 = vset.pattern.permute.xlu0 %v1134_v48 }
  0x54   : > { %892 = vset.pattern.permute.xlu2 %v1133_v1  ;;  %352 = vperm.xlu0 %894, %v1257_v2  }
  0x55   : > { %200 = vperm.xlu2 %892, %v1286_v9  }
  0x5a   : > { %264 = vperm.xlu1 %891, %v1280_v8  }
  0x5c   : > { %332 = vperm.xlu0 %894, %v1278_v7  }
  0x5d   : > { %893 = vset.pattern.permute.xlu2 %v1132_v0 }
  0x5e   : > { %260 = vperm.xlu2 %893, %v1286_v9  }
  0x62   : > { %895 = vset.pattern.permute.xlu1 %v1134_v48 }
  0x63   : > { %348 = vperm.xlu1 %895, %v1261_v3  }
  0x66   : > { %896 = vset.pattern.permute.xlu2 %v1134_v48 }
  0x67   : > { %344 = vperm.xlu2 %896, %v1264_v4  }
  0x6b   : > { %340 = vperm.xlu1 %895, %v1266_v5  }
  0x6f   : > { %336 = vperm.xlu2 %896, %v1273_v6  }
  0x73   : > { %328 = vperm.xlu1 %895, %v1280_v8  }
  0x77   : > { %324 = vperm.xlu2 %896, %v1286_v9  }
  0x8b   : > { %v285_v10 = vpop.permute.xlu2 %284 }
  0x95   : > { %v221_v12 = vpop.permute.xlu2 %220 }
  0x96   : > { %v251_v30 = vmul.f32 %v1294_v13, %v221_v12  ;;  %v252_v31 = vmul.f32 %v1296_v14, %v221_v12 }
  0x9e   : > { %v277_v21 = vpop.permute.xlu2 %276 }
  0x9f   : > { %v299_v35 = vadd.f32 %v277_v21, %v251_v30  ;;  %v300_v43 = vadd.f32 %v277_v21, %v252_v31 }
  0xa2   : > { %v289_v15 = vpop.permute.xlu1 %288 }
  0xa3   : > { %v236_v16 = vpop.permute.xlu0 %235 }
  0xa4   : > { %v257_v17 = vmul.f32 %v1294_v13, %v236_v16  ;;  %v258_v18 = vmul.f32 %v1296_v14, %v236_v16 }
  0xa6   : > { %v305_v19 = vadd.f32 %v289_v15, %v257_v17  ;;  %v306_v20 = vadd.f32 %v289_v15, %v258_v18  ;;  %v273_v34 = vpop.permute.xlu2 %272 }
  0xa8   : > { %901 = vtanh.f32 %v305_v19 }
  0xa9   : > { %903 = vtanh.f32 %v306_v20 }
  0xab   : > { %v231_v22 = vpop.permute.xlu0 %230  ;;  %v226_v25 = vpop.permute.xlu1 %225 }
  0xac   : > { %v255_v23 = vmul.f32 %v1294_v13, %v231_v22  ;;  %v256_v24 = vmul.f32 %v1296_v14, %v231_v22  ;;  %v253_v32 = vmul.f32 %v1294_v13, %v226_v25  ;;  %v254_v33 = vmul.f32 %v1296_v14, %v226_v25 }
  0xae   : > { %v902_v26 = vpop.eup %901  ;;  %v303_v27 = vadd.f32 %v285_v10, %v255_v23  ;;  %v304_v28 = vadd.f32 %v285_v10, %v256_v24 }
  0xaf   : > { %v904_v29 = vpop.eup %903  ;;  %380 = vmatpush.msra.mxu0 %v902_v26  ;;  %v201_v54 = vpop.permute.xlu2 %200 }
  0xb0   : > { %905 = vtanh.f32 %v303_v27  ;;  %421 = vmatpush.msra.mxu1 %v904_v29  ;;  %v243_v62 = vmul.f32 %v1294_v13, %v201_v54  ;;  %v244_v10 = vmul.f32 %v1296_v14, %v201_v54 }
  0xb1   : > { %907 = vtanh.f32 %v304_v28 }
  0xb3   : > { %v216_v37 = vpop.permute.xlu1 %215 }
  0xb4   : > { %v281_v36 = vpop.permute.xlu0 %280  ;;  %v249_v40 = vmul.f32 %v1294_v13, %v216_v37  ;;  %v250_v41 = vmul.f32 %v1296_v14, %v216_v37 }
  0xb5   : > { %v301_v38 = vadd.f32 %v281_v36, %v253_v32  ;;  %v302_v39 = vadd.f32 %v281_v36, %v254_v33 }
  0xb6   : > { %v906_v42 = vpop.eup %905  ;;  %v297_v45 = vadd.f32 %v273_v34, %v249_v40  ;;  %v298_v46 = vadd.f32 %v273_v34, %v250_v41 }
  0xb7   : > { %v908_v44 = vpop.eup %907  ;;  %909 = vtanh.f32 %v301_v38  ;;  %381 = vmatpush.msra.mxu0 %v906_v42 }
  0xb8   : > { %911 = vtanh.f32 %v302_v39  ;;  %422 = vmatpush.msra.mxu1 %v908_v44  ;;  %v261_v11 = vpop.permute.xlu2 %260  ;;  %v1135_v39 = vmov 67  }
  0xb9   : > { %913 = vtanh.f32 %v299_v35  ;;  %v291_v16 = vadd.f32 %v261_v11, %v243_v62  ;;  %v292_v20 = vadd.f32 %v261_v11, %v244_v10  ;;  %898 = vset.pattern.permute.xlu1 %v1135_v39  ;;  %897 = vset.pattern.permute.xlu0 %v1135_v39 }
  0xba   : > { %915 = vtanh.f32 %v300_v43  ;;  %495 = vperm.xlu1 %898, %v1261_v3   ;;  %899 = vset.pattern.permute.xlu2 %v1135_v39 }
  0xbb   : > { %917 = vtanh.f32 %v297_v45  ;;  %v211_v47 = vpop.permute.xlu1 %210  ;;  %499 = vperm.xlu0 %897, %v1257_v2   ;;  %491 = vperm.xlu2 %899, %v1264_v4  }
  0xbc   : > { %919 = vtanh.f32 %v298_v46  ;;  %v247_v56 = vmul.f32 %v1294_v13, %v211_v47  ;;  %v248_v57 = vmul.f32 %v1296_v14, %v211_v47 }
  0xbd   : > { %v910_v49 = vpop.eup %909  ;;  %v206_v61 = vpop.permute.xlu0 %205 }
  0xbe   : > { %v912_v50 = vpop.eup %911  ;;  %382 = vmatpush.msra.mxu0 %v910_v49  ;;  %v245_v63 = vmul.f32 %v1294_v13, %v206_v61  ;;  %v246_v0 = vmul.f32 %v1296_v14, %v206_v61 }
  0xbf   : > { %v914_v51 = vpop.eup %913  ;;  %423 = vmatpush.msra.mxu1 %v912_v50 }
  0xc0   : > { %v916_v52 = vpop.eup %915  ;;  %383 = vmatpush.msra.mxu0 %v914_v51 }
  0xc1   : > { %v918_v53 = vpop.eup %917  ;;  %424 = vmatpush.msra.mxu1 %v916_v52  ;;  %v345_v36 = vpop.permute.xlu2 %344 }
  0xc2   : > { %v920_v55 = vpop.eup %919  ;;  %384 = vmatpush.msra.mxu0 %v918_v53  ;;  %487 = vperm.xlu1 %898, %v1266_v5  }
  0xc3   : > { %425 = vmatpush.msra.mxu1 %v920_v55  ;;  %479 = vperm.xlu0 %897, %v1278_v7  }
  0xc4   : > { %v269_v58 = vpop.permute.xlu1 %268  ;;  %483 = vperm.xlu2 %899, %v1273_v6  }
  0xc5   : > { %v295_v59 = vadd.f32 %v269_v58, %v247_v56  ;;  %v296_v60 = vadd.f32 %v269_v58, %v248_v57 }
  0xc6   : > { %v353_v40 = vpop.permute.xlu0 %352 }
  0xc7   : > { %921 = vtanh.f32 %v295_v59 }
  0xc8   : > { %923 = vtanh.f32 %v296_v60 }
  0xc9   : > { %v337_v42 = vpop.permute.xlu2 %336 }
  0xca   : > { %475 = vperm.xlu1 %898, %v1280_v8  }
  0xcb   : > { %900 = vset.pattern.permute.xlu0 %v1133_v1  ;;  %v189_v1 = vld [vmem:[#allocation5 + $0x8] sm:$0xff] }
  0xcc   : > { %v265_v12 = vpop.permute.xlu1 %264  ;;  %471 = vperm.xlu2 %899, %v1286_v9  }
  0xcd   : > { %v922_v15 = vpop.eup %921  ;;  %v293_v17 = vadd.f32 %v265_v12, %v245_v63  ;;  %v294_v18 = vadd.f32 %v265_v12, %v246_v0 }
  0xce   : > { %v924_v19 = vpop.eup %923  ;;  %385 = vmatpush.msra.mxu0 %v922_v15 }
  0xcf   : > { %925 = vtanh.f32 %v293_v17  ;;  %426 = vmatpush.msra.mxu1 %v924_v19  ;;  %v190_v19 = vld [vmem:[#allocation5 + $0x18] sm:$0xff] }
  0xd0   : > { %927 = vtanh.f32 %v294_v18 }
  0xd1   : > { %929 = vtanh.f32 %v291_v16  ;;  %v325_v57 = vpop.permute.xlu2 %324 }
  0xd2   : > { %931 = vtanh.f32 %v292_v20  ;;  %v191_v20 = vld [vmem:[#allocation5 + $0x28] sm:$0xff] }
  0xd5   : > { %v926_v13 = vpop.eup %925  ;;  %v349_v35 = vpop.permute.xlu1 %348 }
  0xd6   : > { %v928_v14 = vpop.eup %927  ;;  %386 = vmatpush.msra.mxu0 %v926_v13  ;;  %v192_v13 = vld [vmem:[#allocation5 + $0x38] sm:$0xff] }
  0xd7   : > { %v930_v21 = vpop.eup %929  ;;  %427 = vmatpush.msra.mxu1 %v928_v14  ;;  %v193_v14 = vld [vmem:[#allocation5 + $0x48] sm:$0xff] }
  0xd8   : > { %v932_v22 = vpop.eup %931  ;;  %387 = vmatpush.msra.mxu0 %v930_v21  ;;  %v194_v21 = vld [vmem:[#allocation5 + $0x58] sm:$0xff] }
  0xd9   : > { %428 = vmatpush.msra.mxu1 %v932_v22  ;;  %780 = vmatmul.msk.f32.vlgmr.msra.gmra.mxu0 %vm355_vm0, %v1286_v9  ;;  %v195_v22 = vld [vmem:[#allocation5 + $0x68] sm:$0xff] }
  0xda   : > { %788 = vmatmul.msk.f32.vlgmr.msra.gmra.mxu1 %vm355_vm0, %v1286_v9 }
  0xdd   : > { %v341_v41 = vpop.permute.xlu1 %340 }
  0xe1   : > { %781 = vmatmul.msk.f32.gmra.mxu0 %vm355_vm0, %v1280_v8 }
  0xe2   : > { %789 = vmatmul.msk.f32.gmra.mxu1 %vm355_vm0, %v1280_v8 }
  0xe5   : > { %v329_v52 = vpop.permute.xlu1 %328 }
  0xe9   : > { %782 = vmatmul.msk.f32.gmra.mxu0 %vm355_vm0, %v1278_v7 }
  0xea   : > { %790 = vmatmul.msk.f32.gmra.mxu1 %vm355_vm0, %v1278_v7 }
  0xf1   : > { %783 = vmatmul.msk.f32.gmra.mxu0 %vm355_vm0, %v1273_v6 }
  0xf2   : > { %791 = vmatmul.msk.f32.gmra.mxu1 %vm355_vm0, %v1273_v6 }
  0xf9   : > { %784 = vmatmul.msk.f32.gmra.mxu0 %vm355_vm0, %v1266_v5 }
  0xfa   : > { %792 = vmatmul.msk.f32.gmra.mxu1 %vm355_vm0, %v1266_v5 }
 0x101   : > { %785 = vmatmul.msk.f32.gmra.mxu0 %vm355_vm0, %v1264_v4 }
 0x102   : > { %793 = vmatmul.msk.f32.gmra.mxu1 %vm355_vm0, %v1264_v4 }
 0x109   : > { %786 = vmatmul.msk.f32.gmra.mxu0 %vm355_vm0, %v1261_v3 }
 0x10a   : > { %794 = vmatmul.msk.f32.gmra.mxu1 %vm355_vm0, %v1261_v3 }
 0x111   : > { %787 = vmatmul.msk.f32.gmra.mxu0 %vm355_vm0, %v1257_v2 }
 0x112   : > { %795 = vmatmul.msk.f32.gmra.mxu1 %vm355_vm0, %v1257_v2  ;;  %v333_v2 = vpop.permute.xlu0 %332 }
 0x156   : > { %v1354_v23 = vpop.f32.mrf.mxu0 }
 0x157   : > { %v1356_v24 = vpop.f32.mrf.mxu1  ;;  %v390_v61 = vadd.f32 %v1354_v23, %v325_v57  ;;  %v196_v23 = vld [vmem:[#allocation5 + $0x78] sm:$0xff] }
 0x158   : > { %v431_v63 = vadd.f32 %v1356_v24, %v325_v57 }
 0x15e   : > { %v392_v25 = vpop.f32.mrf.mxu0 }
 0x15f   : > { %v433_v26 = vpop.f32.mrf.mxu1  ;;  %v393_v7 = vadd.f32 %v392_v25, %v329_v52 }
 0x160   : > { %v434_v59 = vadd.f32 %v433_v26, %v329_v52 }
 0x166   : > { %v395_v27 = vpop.f32.mrf.mxu0 }
 0x167   : > { %v436_v28 = vpop.f32.mrf.mxu1  ;;  %v396_v55 = vadd.f32 %v395_v27, %v333_v2 }
 0x168   : > { %v437_v5 = vadd.f32 %v436_v28, %v333_v2 }
 0x16e   : > { %v398_v29 = vpop.f32.mrf.mxu0 }
 0x16f   : > { %v439_v30 = vpop.f32.mrf.mxu1  ;;  %v399_v51 = vadd.f32 %v398_v29, %v337_v42 }
 0x170   : > { %v440_v53 = vadd.f32 %v439_v30, %v337_v42 }
 0x176   : > { %v401_v31 = vpop.f32.mrf.mxu0 }
 0x177   : > { %v442_v32 = vpop.f32.mrf.mxu1  ;;  %v402_v3 = vadd.f32 %v401_v31, %v341_v41 }
 0x178   : > { %v443_v4 = vadd.f32 %v442_v32, %v341_v41  ;;  %v500_v41 = vpop.permute.xlu0 %499 }
 0x17e   : > { %v404_v33 = vpop.f32.mrf.mxu0 }
 0x17f   : > { %v445_v34 = vpop.f32.mrf.mxu1  ;;  %v405_v49 = vadd.f32 %v404_v33, %v345_v36 }
 0x180   : > { %v446_v50 = vadd.f32 %v445_v34, %v345_v36  ;;  %v496_v36 = vpop.permute.xlu1 %495 }
 0x186   : > { %v407_v37 = vpop.f32.mrf.mxu0 }
 0x187   : > { %v448_v38 = vpop.f32.mrf.mxu1  ;;  %v408_v44 = vadd.f32 %v407_v37, %v349_v35  ;;  %v492_v37 = vpop.permute.xlu2 %491 }
 0x188   : > { %v449_v47 = vadd.f32 %v448_v38, %v349_v35  ;;  %v488_v42 = vpop.permute.xlu1 %487 }
 0x18e   : > { %v410_v43 = vpop.f32.mrf.mxu0 }
 0x18f   : > { %v411_v45 = vadd.f32 %v410_v43, %v353_v40  ;;  %v451_v46 = vpop.f32.mrf.mxu1  ;;  %v484_v43 = vpop.permute.xlu2 %483 }
 0x190   : > { %v452_v48 = vadd.f32 %v451_v46, %v353_v40  ;;  %v1385_v40 = vld [vmem:[#allocation5 + $0x80] sm:$0xff] }
 0x191   : > { %933 = vtanh.f32 %v411_v45  ;;  %626 = vperm.xlu0 %900, %v1385_v40  }
 0x192   : > { %935 = vtanh.f32 %v452_v48 }
 0x193   : > { %937 = vtanh.f32 %v408_v44 }
 0x194   : > { %939 = vtanh.f32 %v449_v47 }
 0x195   : > { %941 = vtanh.f32 %v405_v49 }
 0x196   : > { %943 = vtanh.f32 %v446_v50 }
 0x197   : > { %v934_v54 = vpop.eup %933  ;;  %945 = vtanh.f32 %v402_v3 }
 0x198   : > { %v936_v56 = vpop.eup %935  ;;  %947 = vtanh.f32 %v443_v4  ;;  %534 = vmatpush.msra.mxu2 %v934_v54  ;;  %v480_v4 = vpop.permute.xlu0 %479 }
 0x199   : > { %v938_v58 = vpop.eup %937  ;;  %949 = vtanh.f32 %v399_v51  ;;  %575 = vmatpush.msra.mxu3 %v936_v56 }
 0x19a   : > { %v940_v6 = vpop.eup %939  ;;  %951 = vtanh.f32 %v440_v53  ;;  %535 = vmatpush.msra.mxu2 %v938_v58  ;;  %v476_v53 = vpop.permute.xlu1 %475 }
 0x19b   : > { %v942_v60 = vpop.eup %941  ;;  %953 = vtanh.f32 %v396_v55  ;;  %576 = vmatpush.msra.mxu3 %v940_v6 }
 0x19c   : > { %v944_v62 = vpop.eup %943  ;;  %955 = vtanh.f32 %v437_v5  ;;  %536 = vmatpush.msra.mxu2 %v942_v60  ;;  %v472_v5 = vpop.permute.xlu2 %471 }
 0x19d   : > { %v946_v0 = vpop.eup %945  ;;  %957 = vtanh.f32 %v393_v7  ;;  %577 = vmatpush.msra.mxu3 %v944_v62 }
 0x19e   : > { %v948_v10 = vpop.eup %947  ;;  %959 = vtanh.f32 %v434_v59  ;;  %537 = vmatpush.msra.mxu2 %v946_v0 }
 0x19f   : > { %v950_v8 = vpop.eup %949  ;;  %961 = vtanh.f32 %v390_v61  ;;  %578 = vmatpush.msra.mxu3 %v948_v10 }
 0x1a0   : > { %v952_v11 = vpop.eup %951  ;;  %963 = vtanh.f32 %v431_v63  ;;  %538 = vmatpush.msra.mxu2 %v950_v8 }
 0x1a1   : > { %v954_v9 = vpop.eup %953  ;;  %579 = vmatpush.msra.mxu3 %v952_v11 }
 0x1a2   : > { %v956_v12 = vpop.eup %955  ;;  %539 = vmatpush.msra.mxu2 %v954_v9 }
 0x1a3   : > { %v958_v15 = vpop.eup %957  ;;  %580 = vmatpush.msra.mxu3 %v956_v12 }
 0x1a4   : > { %v960_v16 = vpop.eup %959  ;;  %540 = vmatpush.msra.mxu2 %v958_v15 }
 0x1a5   : > { %v962_v17 = vpop.eup %961  ;;  %581 = vmatpush.msra.mxu3 %v960_v16 }
 0x1a6   : > { %v964_v18 = vpop.eup %963  ;;  %541 = vmatpush.msra.mxu2 %v962_v17 }
 0x1a7   : > { %582 = vmatpush.msra.mxu3 %v964_v18  ;;  %796 = vmatmul.msk.f32.vlgmr.msra.gmra.mxu2 %vm355_vm0, %v189_v1 }
 0x1a8   : > { %804 = vmatmul.msk.f32.vlgmr.msra.gmra.mxu3 %vm355_vm0, %v189_v1 }
 0x1af   : > { %797 = vmatmul.msk.f32.gmra.mxu2 %vm355_vm0, %v190_v19 }
 0x1b0   : > { %805 = vmatmul.msk.f32.gmra.mxu3 %vm355_vm0, %v190_v19 }
 0x1b7   : > { %798 = vmatmul.msk.f32.gmra.mxu2 %vm355_vm0, %v191_v20 }
 0x1b8   : > { %806 = vmatmul.msk.f32.gmra.mxu3 %vm355_vm0, %v191_v20 }
 0x1bf   : > { %799 = vmatmul.msk.f32.gmra.mxu2 %vm355_vm0, %v192_v13 }
 0x1c0   : > { %807 = vmatmul.msk.f32.gmra.mxu3 %vm355_vm0, %v192_v13 }
 0x1c7   : > { %800 = vmatmul.msk.f32.gmra.mxu2 %vm355_vm0, %v193_v14 }
 0x1c8   : > { %808 = vmatmul.msk.f32.gmra.mxu3 %vm355_vm0, %v193_v14 }
 0x1cf   : > { %801 = vmatmul.msk.f32.gmra.mxu2 %vm355_vm0, %v194_v21 }
 0x1d0   : > { %809 = vmatmul.msk.f32.gmra.mxu3 %vm355_vm0, %v194_v21 }
 0x1d7   : > { %802 = vmatmul.msk.f32.gmra.mxu2 %vm355_vm0, %v195_v22 }
 0x1d8   : > { %810 = vmatmul.msk.f32.gmra.mxu3 %vm355_vm0, %v195_v22 }
 0x1df   : > { %803 = vmatmul.msk.f32.gmra.mxu2 %vm355_vm0, %v196_v23 }
 0x1e0   : > { %811 = vmatmul.msk.f32.gmra.mxu3 %vm355_vm0, %v196_v23 }
 0x203   : > { %v627_v19 = vpop.permute.xlu0 %626 }
 0x22a   : > { %v543_v24 = vpop.f32.mrf.mxu2 }
 0x22b   : > { %v584_v25 = vpop.f32.mrf.mxu3  ;;  %v544_v62 = vadd.f32 %v543_v24, %v472_v5 }
 0x22c   : > { %v585_v0 = vadd.f32 %v584_v25, %v472_v5 }
 0x232   : > { %v546_v26 = vpop.f32.mrf.mxu2 }
 0x233   : > { %v587_v27 = vpop.f32.mrf.mxu3  ;;  %v547_v6 = vadd.f32 %v546_v26, %v476_v53 }
 0x234   : > { %v588_v60 = vadd.f32 %v587_v27, %v476_v53 }
 0x23a   : > { %v549_v28 = vpop.f32.mrf.mxu2 }
 0x23b   : > { %v590_v29 = vpop.f32.mrf.mxu3  ;;  %v550_v56 = vadd.f32 %v549_v28, %v480_v4 }
 0x23c   : > { %v591_v58 = vadd.f32 %v590_v29, %v480_v4 }
 0x242   : > { %v552_v30 = vpop.f32.mrf.mxu2 }
 0x243   : > { %v593_v31 = vpop.f32.mrf.mxu3  ;;  %v553_v52 = vadd.f32 %v552_v30, %v484_v43 }
 0x244   : > { %v594_v54 = vadd.f32 %v593_v31, %v484_v43 }
 0x24a   : > { %v555_v32 = vpop.f32.mrf.mxu2 }
 0x24b   : > { %v596_v33 = vpop.f32.mrf.mxu3  ;;  %v556_v2 = vadd.f32 %v555_v32, %v488_v42 }
 0x24c   : > { %v597_v51 = vadd.f32 %v596_v33, %v488_v42 }
 0x252   : > { %v558_v34 = vpop.f32.mrf.mxu2 }
 0x253   : > { %v599_v35 = vpop.f32.mrf.mxu3  ;;  %v559_v50 = vadd.f32 %v558_v34, %v492_v37 }
 0x254   : > { %v600_v3 = vadd.f32 %v599_v35, %v492_v37 }
 0x25a   : > { %v561_v38 = vpop.f32.mrf.mxu2 }
 0x25b   : > { %v602_v39 = vpop.f32.mrf.mxu3  ;;  %v562_v45 = vadd.f32 %v561_v38, %v496_v36 }
 0x25c   : > { %v603_v48 = vadd.f32 %v602_v39, %v496_v36 }
 0x262   : > { %v564_v44 = vpop.f32.mrf.mxu2 }
 0x263   : > { %v565_v46 = vadd.f32 %v564_v44, %v500_v41  ;;  %v605_v47 = vpop.f32.mrf.mxu3 }
 0x264   : > { %v606_v49 = vadd.f32 %v605_v47, %v500_v41 }
 0x265   : > { %965 = vtanh.f32 %v565_v46 }
 0x266   : > { %967 = vtanh.f32 %v606_v49 }
 0x267   : > { %969 = vtanh.f32 %v562_v45 }
 0x268   : > { %971 = vtanh.f32 %v603_v48 }
 0x269   : > { %973 = vtanh.f32 %v559_v50 }
 0x26a   : > { %975 = vtanh.f32 %v600_v3 }
 0x26b   : > { %v966_v55 = vpop.eup %965  ;;  %977 = vtanh.f32 %v556_v2 }
 0x26c   : > { %v968_v57 = vpop.eup %967  ;;  %979 = vtanh.f32 %v597_v51  ;;  %639 = vmatpush.msrb.mxu0 %v966_v55 }
 0x26d   : > { %v970_v7 = vpop.eup %969  ;;  %981 = vtanh.f32 %v553_v52  ;;  %659 = vmatpush.msrb.mxu1 %v968_v57 }
 0x26e   : > { %v972_v59 = vpop.eup %971  ;;  %983 = vtanh.f32 %v594_v54  ;;  %640 = vmatpush.msrb.mxu0 %v970_v7 }
 0x26f   : > { %v974_v61 = vpop.eup %973  ;;  %985 = vtanh.f32 %v550_v56  ;;  %660 = vmatpush.msrb.mxu1 %v972_v59 }
 0x270   : > { %v976_v63 = vpop.eup %975  ;;  %987 = vtanh.f32 %v591_v58  ;;  %641 = vmatpush.msrb.mxu0 %v974_v61 }
 0x271   : > { %v978_v10 = vpop.eup %977  ;;  %989 = vtanh.f32 %v547_v6  ;;  %661 = vmatpush.msrb.mxu1 %v976_v63 }
 0x272   : > { %v980_v8 = vpop.eup %979  ;;  %991 = vtanh.f32 %v588_v60  ;;  %642 = vmatpush.msrb.mxu0 %v978_v10 }
 0x273   : > { %v982_v11 = vpop.eup %981  ;;  %993 = vtanh.f32 %v544_v62  ;;  %662 = vmatpush.msrb.mxu1 %v980_v8 }
 0x274   : > { %v984_v9 = vpop.eup %983  ;;  %995 = vtanh.f32 %v585_v0  ;;  %643 = vmatpush.msrb.mxu0 %v982_v11 }
 0x275   : > { %v986_v12 = vpop.eup %985  ;;  %663 = vmatpush.msrb.mxu1 %v984_v9 }
 0x276   : > { %v988_v15 = vpop.eup %987  ;;  %644 = vmatpush.msrb.mxu0 %v986_v12 }
 0x277   : > { %v990_v16 = vpop.eup %989  ;;  %664 = vmatpush.msrb.mxu1 %v988_v15 }
 0x278   : > { %v992_v1 = vpop.eup %991  ;;  %645 = vmatpush.msrb.mxu0 %v990_v16 }
 0x279   : > { %v994_v17 = vpop.eup %993  ;;  %665 = vmatpush.msrb.mxu1 %v992_v1 }
 0x27a   : > { %v996_v18 = vpop.eup %995  ;;  %646 = vmatpush.msrb.mxu0 %v994_v17 }
 0x27b   : > { %666 = vmatpush.msrb.mxu1 %v996_v18  ;;  %812 = vmatmul.msk.f32.vlgmr.msrb.gmra.mxu0 %vm355_vm0, %v1385_v40 }
 0x27c   : > { %813 = vmatmul.msk.f32.vlgmr.msrb.gmra.mxu1 %vm355_vm0, %v1385_v40 }
 0x2f8   : > { %v648_v20 = vpop.f32.mrf.mxu0 }
 0x2f9   : > { %v649_v13 = vadd.f32 %v648_v20, %v627_v19  ;;  %v668_v14 = vpop.f32.mrf.mxu1 }
 0x2fa   : > { %v669_v21 = vadd.f32 %v668_v14, %v627_v19 }
 0x2fb   : > { %671 = vst [vmem:[%s177_s14] sm:$0xff] %v649_v13 }
 0x2fc   : > { %672 = vst [vmem:[%s177_s14 + $0x8] sm:$0xff] %v669_v21 }
 0x2fd   : > { %1084 = shalt.err (!%p1081_p9)
}
 0x2fe   : > { %826 = dma.vmem_to_hbm [thread:$0]  (%p1211_p13), %s688_s15, 256, %s690_s18, %s674_s19  }
 0x2ff PF: > { %s701_s29 = sand.u32 1, %s1115_s9   ;;  %p1434_p10 = scmp.ge.s32.totalorder %s1127_s12, 2 }
 0x300   : > { %s702_s4 = scalar_lea.sflag [#allocation4], %s701_s29 }
 0x301   : > { %p837_p11 = pnand %p1434_p10, %p1216_p4 }
 0x303   : > { %p838_p0 = pneg %p837_p11 }
 0x305   : > { %1110 = dma.done.wait (%p838_p0), %s702_s4, 256  }
 0x306   : > { %1112 = vsyncadd (%p838_p0), %s702_s4, 4294967040  ;;  %p16_p2 = scmp.ge.s32.totalorder %s1191_s23, 4   ;;  %s1435_s9 = smov %s1119_s10 }
 0x307   : > { %s1436_s10 = smov %s1123_s11  ;;  %s1437_s11 = smov %s1203_s26 }
 0x308   : > { %s1438_s12 = smov %s1191_s23  ;;  %18 = sbr.rel (!%p16_p2) target bundleno = 6 (0x6), region = 77 }
 0x30d   :  { %708 = vsyncpa [#allocation3], 1 }
 0x30e   :  { %710 = vsyncpa [#allocation3 + $0x1], 1 }
 0x30f   :  { %711 = vsyncpa [#allocation6], 1 }
 0x310   :  { %712 = vsyncpa [#allocation4], 1 }
 0x311   :  { %714 = vsyncpa [#allocation4 + $0x1], 1 }

</bundles_post_ra>
